<compile_context>
chip_gen: v5e
topology: v5e:2x2
jax: 0.10.0
libtpu: 0.0.40
codegen_flags: <defaults>
</compile_context>

<pallas_src>
import functools

import jax
import jax.numpy as jnp
from jax.experimental import pallas as pl
from jax.experimental.pallas import tpu as pltpu

LN_EPS = 1e-5


def _round_up(x, m):
    return ((x + m - 1) // m) * m


def _cdiv(a, b):
    return -(-a // b)


# ---------------------------------------------------------------------------
# Kernel
# ---------------------------------------------------------------------------
def _critic2_kernel(
    # streamed inputs (native dtype; cast to bf16 on the tile)
    obs_ref, act_ref,
    # trunk params
    wt_ref, bt_ref, ln_g_ref, ln_b_ref,
    # heads: stacked layer-1 split into (feature, action) parts, per-head
    # layer-2, block-diagonal layer-3
    w1h_ref, w1a_ref, b1_ref,
    w2a_ref, b2a_ref, w2b_ref, b2b_ref,
    w3_ref, b3_ref,
    # output (TB, 2): column 0 = q1, column 1 = q2
    q_ref,
    # scratch: f32 trunk accumulator
    acc_ref,
    *, hidden_dim,
):
    k = pl.program_id(1)

    @pl.when(k == 0)
    def _():
        acc_ref[...] = jnp.zeros_like(acc_ref)

    # Trunk Linear, accumulated over the obs_dim (K) grid axis.  bf16 MXU,
    # f32 accumulation.  Cast happens on the VMEM tile (no wrapper copy).
    acc_ref[...] += jnp.dot(obs_ref[...].astype(jnp.bfloat16), wt_ref[...],
                            preferred_element_type=jnp.float32)

    @pl.when(k == pl.num_programs(1) - 1)
    def _():
        # LayerNorm (biased variance, eps inside rsqrt — matches torch) + Tanh,
        # all in f32.
        z = acc_ref[...] + bt_ref[...]
        mean = jnp.mean(z, axis=-1, keepdims=True)
        var = jnp.mean(jnp.square(z - mean), axis=-1, keepdims=True)
        h = jnp.tanh((z - mean) * jax.lax.rsqrt(var + LN_EPS)
                     * ln_g_ref[...] + ln_b_ref[...])

        # concat-free layer 1 for BOTH heads (stacked along the output dim):
        #   x = h @ w1[:F] + action @ w1[F:] + b1
        x = (jnp.dot(h.astype(jnp.bfloat16), w1h_ref[...],
                     preferred_element_type=jnp.float32)
             + jnp.dot(act_ref[...].astype(jnp.bfloat16), w1a_ref[...],
                       preferred_element_type=jnp.float32)
             + b1_ref[...])
        x = jnp.maximum(x, 0.0)

        # Layer 2 stays per-head (inputs differ per head).
        H = hidden_dim
        x1 = jnp.dot(x[:, :H].astype(jnp.bfloat16), w2a_ref[...],
                     preferred_element_type=jnp.float32) + b2a_ref[...]
        x2 = jnp.dot(x[:, H:].astype(jnp.bfloat16), w2b_ref[...],
                     preferred_element_type=jnp.float32) + b2b_ref[...]
        xr = jnp.concatenate([jnp.maximum(x1, 0.0), jnp.maximum(x2, 0.0)],
                             axis=-1).astype(jnp.bfloat16)

        # Block-diagonal final layer: (TB, 2H) @ (2H, 2) -> lane-dense (TB, 2).
        q_ref[...] = (jnp.dot(xr, w3_ref[...], preferred_element_type=jnp.float32)
                      + b3_ref[...])


# ---------------------------------------------------------------------------
# One-time parameter packing (hoisted out of the per-call path)
# ---------------------------------------------------------------------------
def _choose_tk(obs_dim, tk_target):
    """K-tile size: prefer a 128-aligned divisor of obs_dim (no obs padding)."""
    tk_target = max(128, (tk_target // 128) * 128)
    if obs_dim <= tk_target:
        return obs_dim                       # single K block == full dim
    for tk in range(tk_target, 0, -128):
        if obs_dim % tk == 0:
            return tk                        # divides exactly, 128-aligned
    return tk_target                         # fallback: obs K-padded per call


def prepare_params(params, obs_dim, *, tk=2048):
    """Pack f32 master params into the kernel layout (bf16 weights, split /
    stacked / block-diagonal head weights, K-padded trunk weight). Call once."""
    bf16 = jnp.bfloat16
    feature_dim = params["wt"].shape[1]
    H = params["q1_w2"].shape[0]
    action_dim = params["q1_w1"].shape[0] - feature_dim

    TK = _choose_tk(obs_dim, tk)
    Kp = _round_up(obs_dim, TK)

    wt = params["wt"].astype(bf16)
    if Kp != obs_dim:
        wt = jnp.zeros((Kp, feature_dim), bf16).at[:obs_dim].set(wt)

    # layer 1: stack both heads along the output dim, then split h/action parts
    w1 = jnp.concatenate([params["q1_w1"], params["q2_w1"]], axis=1).astype(bf16)
    w1h, w1a = w1[:feature_dim], w1[feature_dim:]
    b1 = jnp.concatenate([params["q1_b1"], params["q2_b1"]], axis=1)

    # layer 3: block-diagonal (2H, 2)
    w3 = jnp.zeros((2 * H, 2), jnp.float32)
    w3 = w3.at[:H, 0:1].set(params["q1_w3"]).at[H:, 1:2].set(params["q2_w3"])

    return dict(
        obs_dim=obs_dim, kp=Kp, tk=TK,
        feature_dim=feature_dim, hidden_dim=H, action_dim=action_dim,
        wt=wt, bt=params["bt"], ln_g=params["ln_g"], ln_b=params["ln_b"],
        w1h=w1h, w1a=w1a, b1=b1,
        w2a=params["q1_w2"].astype(bf16), b2a=params["q1_b2"],
        w2b=params["q2_w2"].astype(bf16), b2b=params["q2_b2"],
        w3=w3.astype(bf16),
        b3=jnp.concatenate([params["q1_b3"], params["q2_b3"]], axis=1),
    )


# ---------------------------------------------------------------------------
# VMEM budget (generation-aware, counts double-buffering of resident weights)
# ---------------------------------------------------------------------------
def _vmem_limit_bytes(TB, TK, A, F, H, in_itemsize):
    bf, f4 = 2, 4
    # double-buffered streamed operands (obs tile, trunk weight tile, action tile)
    streamed = 2 * (TB * TK * in_itemsize + TK * F * bf + TB * A * in_itemsize)
    # resident head weights / biases — Pallas double-buffers these too
    resident = 2 * ((F + A) * 2 * H * bf + 2 * H * H * bf + 2 * H * 2 * bf
                    + (3 * F + 4 * H + 2 + 2 * H) * f4)
    # accumulator scratch + output + working intermediates headroom
    work = TB * F * f4 + TB * 2 * f4 + 8 * TB * 2 * H * f4
    est = streamed + resident + work
    try:
        cap = pltpu.get_tpu_info().vmem_capacity_bytes
    except Exception:
        cap = 128 * 1024 * 1024
    # leave headroom: ~48 MiB on 64 MiB parts (v7x), ~96-100 MiB on 128 MiB parts
    cap = int(min(cap * 3 // 4, 100 * 1024 * 1024))
    return int(min(max(int(1.3 * est), 32 * 1024 * 1024), cap))


# ---------------------------------------------------------------------------
# Forward
# ---------------------------------------------------------------------------
def critic2_forward(obs, action, packed, *, tb=256, batch_tiles=None):
    """obs: (B, obs_dim), action: (B, action_dim) -> (q1, q2), each (B, 1).

    `packed` comes from prepare_params().  `batch_tiles=2` is recommended on
    v7x (2 TensorCores); the default single batch tile (for B <= tb) is best on
    single-TC v5e/v6e since the trunk weight is then streamed exactly once.
    """
    B = obs.shape[0]
    obs_dim, Kp, TK = packed["obs_dim"], packed["kp"], packed["tk"]
    F, H, A = packed["feature_dim"], packed["hidden_dim"], packed["action_dim"]

    # obs streamed in native dtype; K-pad only if no aligned divisor existed.
    if Kp != obs_dim:
        # TODO(synk): per-call K-pad copy; only taken when obs_dim has no
        # 128-aligned divisor <= tk (wt rows beyond obs_dim are zero, so the
        # padded columns contribute nothing).
        obs_in = jnp.zeros((B, Kp), obs.dtype).at[:, :obs_dim].set(obs)
    else:
        obs_in = obs

    # Batch tile: single tile when B <= tb (v5e/v6e); otherwise tb-sized tiles.
    if batch_tiles is None or batch_tiles <= 1:
        TB = B if B <= tb else tb
    else:
        TB = _round_up(_cdiv(B, batch_tiles), 8)
    if TB >= B:
        TB = B                      # block == full dim: always legal
    grid_b = _cdiv(B, TB)
    grid = (grid_b, Kp // TK)

    args = (obs_in, action,
            packed["wt"], packed["bt"], packed["ln_g"], packed["ln_b"],
            packed["w1h"], packed["w1a"], packed["b1"],
            packed["w2a"], packed["b2a"], packed["w2b"], packed["b2b"],
            packed["w3"], packed["b3"])

    def resident(shape):
        return pl.BlockSpec(shape, lambda i, k: (0,) * len(shape))

    in_specs = [
        pl.BlockSpec((TB, TK), lambda i, k: (i, k)),   # obs tile (streamed)
        pl.BlockSpec((TB, A), lambda i, k: (i, 0)),    # action tile (streamed)
        pl.BlockSpec((TK, F), lambda i, k: (k, 0)),    # trunk weight tile
        resident((1, F)),                              # bt
        resident((1, F)),                              # ln_g
        resident((1, F)),                              # ln_b
        resident((F, 2 * H)),                          # w1 (h part, both heads)
        resident((A, 2 * H)),                          # w1 (action part)
        resident((1, 2 * H)),                          # b1
        resident((H, H)), resident((1, H)),            # q1 w2 / b2
        resident((H, H)), resident((1, H)),            # q2 w2 / b2
        resident((2 * H, 2)), resident((1, 2)),        # block-diag w3 / b3
    ]
    out_specs = pl.BlockSpec((TB, 2), lambda i, k: (i, 0))

    q = pl.pallas_call(
        functools.partial(_critic2_kernel, hidden_dim=H),
        out_shape=jax.ShapeDtypeStruct((B, 2), jnp.float32),
        grid_spec=pltpu.PrefetchScalarGridSpec(
            num_scalar_prefetch=0,
            grid=grid,
            in_specs=in_specs,
            out_specs=out_specs,
            scratch_shapes=[pltpu.VMEM((TB, F), jnp.float32)],
        ),
        compiler_params=pltpu.CompilerParams(
            dimension_semantics=("parallel", "arbitrary"),
            vmem_limit_bytes=_vmem_limit_bytes(
                TB, TK, A, F, H, jnp.dtype(obs.dtype).itemsize),
        ),
    )(*args)

    return q[:, 0:1], q[:, 1:2]


# ---------------------------------------------------------------------------
# Deterministic synthetic parameters (shapes follow __init__ with
# obs_type='pixels').  Linear weights stored pre-transposed (in_f, out_f);
# biases / LN params as (1, features) rows, all f32 (master copies).
# ---------------------------------------------------------------------------
def init_params(key, obs_dim, action_dim, feature_dim, hidden_dim):
    trunk_dim = feature_dim + action_dim
    names_shapes = [
        ("wt", (obs_dim, feature_dim)), ("bt", (1, feature_dim)),
        ("ln_g", (1, feature_dim)), ("ln_b", (1, feature_dim)),
        ("q1_w1", (trunk_dim, hidden_dim)), ("q1_b1", (1, hidden_dim)),
        ("q1_w2", (hidden_dim, hidden_dim)), ("q1_b2", (1, hidden_dim)),
        ("q1_w3", (hidden_dim, 1)), ("q1_b3", (1, 1)),
        ("q2_w1", (trunk_dim, hidden_dim)), ("q2_b1", (1, hidden_dim)),
        ("q2_w2", (hidden_dim, hidden_dim)), ("q2_b2", (1, hidden_dim)),
        ("q2_w3", (hidden_dim, 1)), ("q2_b3", (1, 1)),
    ]
    params = {}
    keys = jax.random.split(key, len(names_shapes))
    for k, (name, shape) in zip(keys, names_shapes):
        if name == "ln_g":
            params[name] = 1.0 + 0.1 * jax.random.normal(k, shape, jnp.float32)
        else:
            fan_in = shape[0] if shape[0] > 1 else shape[1]
            params[name] = (jax.random.normal(k, shape, jnp.float32)
                            / jnp.sqrt(float(fan_in)))
    return params


def critic2_reference(obs, action, params):
    """Pure-JAX reference mirroring the kernel's bf16-matmul / f32-accum path."""
    bf16 = jnp.bfloat16
    obs_b, act_b = obs.astype(bf16), action.astype(bf16)
    z = jnp.dot(obs_b, params["wt"].astype(bf16),
                preferred_element_type=jnp.float32) + params["bt"]
    mean = jnp.mean(z, axis=-1, keepdims=True)
    var = jnp.mean(jnp.square(z - mean), axis=-1, keepdims=True)
    h = jnp.tanh((z - mean) * jax.lax.rsqrt(var + LN_EPS) * params["ln_g"]
                 + params["ln_b"])
    hc = jnp.concatenate([h.astype(bf16), act_b], axis=-1)

    def q(pfx):
        x = jnp.dot(hc, params[f"{pfx}_w1"].astype(bf16),
                    preferred_element_type=jnp.float32) + params[f"{pfx}_b1"]
        x = jnp.maximum(x, 0.0)
        x = jnp.dot(x.astype(bf16), params[f"{pfx}_w2"].astype(bf16),
                    preferred_element_type=jnp.float32) + params[f"{pfx}_b2"]
        x = jnp.maximum(x, 0.0)
        return jnp.dot(x.astype(bf16), params[f"{pfx}_w3"].astype(bf16),
                       preferred_element_type=jnp.float32) + params[f"{pfx}_b3"]

    return q("q1"), q("q2")


if __name__ == "__main__":
    B, obs_dim, action_dim, feature_dim, hidden_dim = 16, 384, 8, 64, 128

    key = jax.random.PRNGKey(0)
    k_obs, k_act, k_params = jax.random.split(key, 3)
    obs = jax.random.normal(k_obs, (B, obs_dim), jnp.float32)
    action = jax.random.normal(k_act, (B, action_dim), jnp.float32)
    params = init_params(k_params, obs_dim, action_dim, feature_dim, hidden_dim)

    # One-time packing (bf16 casts, stacked/split w1, block-diag w3, K tiling).
    packed = prepare_params(params, obs_dim, tk=128)   # -> TK=128, 3 K blocks

    # Small batch tiles so the test exercises BOTH grid axes:
    # 2 batch tiles ("parallel") x 3 K tiles ("arbitrary" accumulation).
    q1, q2 = jax.block_until_ready(
        critic2_forward(obs, action, packed, tb=8))

    r1, r2 = critic2_reference(obs, action, params)
    assert q1.shape == (B, 1) and q2.shape == (B, 1)
    assert jnp.allclose(q1, r1, atol=2e-2, rtol=2e-2)
    assert jnp.allclose(q2, r2, atol=2e-2, rtol=2e-2)

    print("KERNEL_OK")
</pallas_src>

<mosaic_0001>
module attributes {stable_mosaic.version = 11 : i64} {
  func.func @_critic2_kernel(%arg0: i32, %arg1: i32, %arg2: memref<8x128xf32, #tpu.memory_space<vmem>>, %arg3: memref<8x8xf32, #tpu.memory_space<vmem>>, %arg4: memref<128x64xbf16, #tpu.memory_space<vmem>>, %arg5: memref<1x64xf32, #tpu.memory_space<vmem>>, %arg6: memref<1x64xf32, #tpu.memory_space<vmem>>, %arg7: memref<1x64xf32, #tpu.memory_space<vmem>>, %arg8: memref<64x256xbf16, #tpu.memory_space<vmem>>, %arg9: memref<8x256xbf16, #tpu.memory_space<vmem>>, %arg10: memref<1x256xf32, #tpu.memory_space<vmem>>, %arg11: memref<128x128xbf16, #tpu.memory_space<vmem>>, %arg12: memref<1x128xf32, #tpu.memory_space<vmem>>, %arg13: memref<128x128xbf16, #tpu.memory_space<vmem>>, %arg14: memref<1x128xf32, #tpu.memory_space<vmem>>, %arg15: memref<256x2xbf16, #tpu.memory_space<vmem>>, %arg16: memref<1x2xf32, #tpu.memory_space<vmem>>, %arg17: memref<8x2xf32, #tpu.memory_space<vmem>>, %arg18: memref<8x64xf32, #tpu.memory_space<vmem>>) attributes {dimension_semantics = [#tpu.dimension_semantics<parallel>, #tpu.dimension_semantics<arbitrary>], iteration_bounds = array<i64: 2, 3>, scalar_prefetch = 0 : i64, scratch_operands = 1 : i64, tpu.core_type = #tpu.core_type<tc>, window_params = [{transform_indices = @transform_0, window_bounds = array<i64: 8, 128>}, {transform_indices = @transform_1, window_bounds = array<i64: 8, 8>}, {transform_indices = @transform_2, window_bounds = array<i64: 128, 64>}, {pipeline_mode = #tpu.pipeline_mode<synchronous>, transform_indices = @transform_3, window_bounds = array<i64: 1, 64>}, {pipeline_mode = #tpu.pipeline_mode<synchronous>, transform_indices = @transform_4, window_bounds = array<i64: 1, 64>}, {pipeline_mode = #tpu.pipeline_mode<synchronous>, transform_indices = @transform_5, window_bounds = array<i64: 1, 64>}, {pipeline_mode = #tpu.pipeline_mode<synchronous>, transform_indices = @transform_6, window_bounds = array<i64: 64, 256>}, {pipeline_mode = #tpu.pipeline_mode<synchronous>, transform_indices = @transform_7, window_bounds = array<i64: 8, 256>}, {pipeline_mode = #tpu.pipeline_mode<synchronous>, transform_indices = @transform_8, window_bounds = array<i64: 1, 256>}, {pipeline_mode = #tpu.pipeline_mode<synchronous>, transform_indices = @transform_9, window_bounds = array<i64: 128, 128>}, {pipeline_mode = #tpu.pipeline_mode<synchronous>, transform_indices = @transform_10, window_bounds = array<i64: 1, 128>}, {pipeline_mode = #tpu.pipeline_mode<synchronous>, transform_indices = @transform_11, window_bounds = array<i64: 128, 128>}, {pipeline_mode = #tpu.pipeline_mode<synchronous>, transform_indices = @transform_12, window_bounds = array<i64: 1, 128>}, {pipeline_mode = #tpu.pipeline_mode<synchronous>, transform_indices = @transform_13, window_bounds = array<i64: 256, 2>}, {pipeline_mode = #tpu.pipeline_mode<synchronous>, transform_indices = @transform_14, window_bounds = array<i64: 1, 2>}, {transform_indices = @transform_15, window_bounds = array<i64: 8, 2>}]} {
    %c0_i32 = arith.constant 0 : i32
    %0 = arith.cmpi eq, %arg1, %c0_i32 : i32
    %1 = arith.extui %0 : i1 to i32
    %c0_i32_0 = arith.constant 0 : i32
    %2 = arith.cmpi ne, %1, %c0_i32_0 : i32
    scf.if %2 {
      %cst_9 = arith.constant 0.000000e+00 : f32
      %13 = vector.broadcast %cst_9 : f32 to vector<8x64xf32>
      %c0_10 = arith.constant 0 : index
      %c0_11 = arith.constant 0 : index
      %14 = vector.load %arg18[%c0_10, %c0_11] : memref<8x64xf32, #tpu.memory_space<vmem>>, vector<8x64xf32>
      tpu.vector_store %arg18[%c0_10, %c0_11], %13 {strides = array<i32>} : memref<8x64xf32, #tpu.memory_space<vmem>>, vector<8x64xf32>,
    } else {
    }
    %c0 = arith.constant 0 : index
    %c0_1 = arith.constant 0 : index
    %3 = vector.load %arg18[%c0, %c0_1] : memref<8x64xf32, #tpu.memory_space<vmem>>, vector<8x64xf32>
    %c0_2 = arith.constant 0 : index
    %c0_3 = arith.constant 0 : index
    %4 = vector.load %arg2[%c0_2, %c0_3] : memref<8x128xf32, #tpu.memory_space<vmem>>, vector<8x128xf32>
    %5 = arith.truncf %4 : vector<8x128xf32> to vector<8x128xbf16>
    %c0_4 = arith.constant 0 : index
    %c0_5 = arith.constant 0 : index
    %6 = vector.load %arg4[%c0_4, %c0_5] : memref<128x64xbf16, #tpu.memory_space<vmem>>, vector<128x64xbf16>
    %cst = arith.constant dense<0.000000e+00> : vector<8x64xf32>
    %7 = tpu.matmul %5, %6, %cst {dimension_numbers = #tpu.dot_dimension_numbers<[1], [0], [0], [1], [0, 0, 1, 1], [], []>} : vector<8x128xbf16>, vector<128x64xbf16>, vector<8x64xf32> -> vector<8x64xf32>
    %8 = arith.addf %3, %7 : vector<8x64xf32>
    %c0_6 = arith.constant 0 : index
    %c0_7 = arith.constant 0 : index
    %9 = vector.load %arg18[%c0_6, %c0_7] : memref<8x64xf32, #tpu.memory_space<vmem>>, vector<8x64xf32>
    tpu.vector_store %arg18[%c0_6, %c0_7], %8 {strides = array<i32>} : memref<8x64xf32, #tpu.memory_space<vmem>>, vector<8x64xf32>,
    %c2_i32 = arith.constant 2 : i32
    %10 = arith.cmpi eq, %arg1, %c2_i32 : i32
    %11 = arith.extui %10 : i1 to i32
    %c0_i32_8 = arith.constant 0 : i32
    %12 = arith.cmpi ne, %11, %c0_i32_8 : i32
    scf.if %12 {
      %c0_9 = arith.constant 0 : index
      %c0_10 = arith.constant 0 : index
      %13 = vector.load %arg18[%c0_9, %c0_10] : memref<8x64xf32, #tpu.memory_space<vmem>>, vector<8x64xf32>
      %c0_11 = arith.constant 0 : index
      %c0_12 = arith.constant 0 : index
      %14 = vector.load %arg5[%c0_11, %c0_12] : memref<1x64xf32, #tpu.memory_space<vmem>>, vector<1x64xf32>
      %15 = vector.broadcast %14 : vector<1x64xf32> to vector<8x64xf32>
      %16 = arith.addf %13, %15 : vector<8x64xf32>
      %cst_13 = arith.constant dense<0.000000e+00> : vector<8xf32>
      %17 = vector.multi_reduction <add>, %16, %cst_13 [1] : vector<8x64xf32> to vector<8xf32>
      %18 = vector.shape_cast %17 : vector<8xf32> to vector<8x1xf32>
      %cst_14 = arith.constant 6.400000e+01 : f32
      %19 = vector.broadcast %cst_14 : f32 to vector<8x1xf32>
      %20 = arith.divf %18, %19 : vector<8x1xf32>
      %21 = vector.broadcast %20 : vector<8x1xf32> to vector<8x64xf32>
      %22 = arith.subf %16, %21 : vector<8x64xf32>
      %23 = arith.mulf %22, %22 : vector<8x64xf32>
      %cst_15 = arith.constant dense<0.000000e+00> : vector<8xf32>
      %24 = vector.multi_reduction <add>, %23, %cst_15 [1] : vector<8x64xf32> to vector<8xf32>
      %25 = vector.shape_cast %24 : vector<8xf32> to vector<8x1xf32>
      %cst_16 = arith.constant 6.400000e+01 : f32
      %26 = vector.broadcast %cst_16 : f32 to vector<8x1xf32>
      %27 = arith.divf %25, %26 : vector<8x1xf32>
      %28 = vector.broadcast %20 : vector<8x1xf32> to vector<8x64xf32>
      %29 = arith.subf %16, %28 : vector<8x64xf32>
      %cst_17 = arith.constant 9.99999974E-6 : f32
      %30 = vector.broadcast %cst_17 : f32 to vector<8x1xf32>
      %31 = arith.addf %27, %30 : vector<8x1xf32>
      %32 = math.rsqrt %31 : vector<8x1xf32>
      %33 = vector.broadcast %32 : vector<8x1xf32> to vector<8x64xf32>
      %34 = arith.mulf %29, %33 : vector<8x64xf32>
      %c0_18 = arith.constant 0 : index
      %c0_19 = arith.constant 0 : index
      %35 = vector.load %arg6[%c0_18, %c0_19] : memref<1x64xf32, #tpu.memory_space<vmem>>, vector<1x64xf32>
      %36 = vector.broadcast %35 : vector<1x64xf32> to vector<8x64xf32>
      %37 = arith.mulf %34, %36 : vector<8x64xf32>
      %c0_20 = arith.constant 0 : index
      %c0_21 = arith.constant 0 : index
      %38 = vector.load %arg7[%c0_20, %c0_21] : memref<1x64xf32, #tpu.memory_space<vmem>>, vector<1x64xf32>
      %39 = vector.broadcast %38 : vector<1x64xf32> to vector<8x64xf32>
      %40 = arith.addf %37, %39 : vector<8x64xf32>
      %41 = math.tanh %40 : vector<8x64xf32>
      %42 = arith.truncf %41 : vector<8x64xf32> to vector<8x64xbf16>
      %c0_22 = arith.constant 0 : index
      %c0_23 = arith.constant 0 : index
      %43 = vector.load %arg8[%c0_22, %c0_23] : memref<64x256xbf16, #tpu.memory_space<vmem>>, vector<64x256xbf16>
      %cst_24 = arith.constant dense<0.000000e+00> : vector<8x256xf32>
      %44 = tpu.matmul %42, %43, %cst_24 {dimension_numbers = #tpu.dot_dimension_numbers<[1], [0], [0], [1], [0, 0, 1, 1], [], []>} : vector<8x64xbf16>, vector<64x256xbf16>, vector<8x256xf32> -> vector<8x256xf32>
      %c0_25 = arith.constant 0 : index
      %c0_26 = arith.constant 0 : index
      %45 = vector.load %arg3[%c0_25, %c0_26] : memref<8x8xf32, #tpu.memory_space<vmem>>, vector<8x8xf32>
      %46 = arith.truncf %45 : vector<8x8xf32> to vector<8x8xbf16>
      %c0_27 = arith.constant 0 : index
      %c0_28 = arith.constant 0 : index
      %47 = vector.load %arg9[%c0_27, %c0_28] : memref<8x256xbf16, #tpu.memory_space<vmem>>, vector<8x256xbf16>
      %cst_29 = arith.constant dense<0.000000e+00> : vector<8x256xf32>
      %48 = tpu.matmul %46, %47, %cst_29 {dimension_numbers = #tpu.dot_dimension_numbers<[1], [0], [0], [1], [0, 0, 1, 1], [], []>} : vector<8x8xbf16>, vector<8x256xbf16>, vector<8x256xf32> -> vector<8x256xf32>
      %49 = arith.addf %44, %48 : vector<8x256xf32>
      %c0_30 = arith.constant 0 : index
      %c0_31 = arith.constant 0 : index
      %50 = vector.load %arg10[%c0_30, %c0_31] : memref<1x256xf32, #tpu.memory_space<vmem>>, vector<1x256xf32>
      %51 = vector.broadcast %50 : vector<1x256xf32> to vector<8x256xf32>
      %52 = arith.addf %49, %51 : vector<8x256xf32>
      %cst_32 = arith.constant 0.000000e+00 : f32
      %53 = vector.broadcast %cst_32 : f32 to vector<8x256xf32>
      %54 = arith.maximumf %52, %53 : vector<8x256xf32>
      %55 = vector.extract_strided_slice %54 {offsets = [0, 0], sizes = [8, 128], strides = [1, 1]} : vector<8x256xf32> to vector<8x128xf32>
      %56 = arith.truncf %55 : vector<8x128xf32> to vector<8x128xbf16>
      %c0_33 = arith.constant 0 : index
      %c0_34 = arith.constant 0 : index
      %57 = vector.load %arg11[%c0_33, %c0_34] : memref<128x128xbf16, #tpu.memory_space<vmem>>, vector<128x128xbf16>
      %cst_35 = arith.constant dense<0.000000e+00> : vector<8x128xf32>
      %58 = tpu.matmul %56, %57, %cst_35 {dimension_numbers = #tpu.dot_dimension_numbers<[1], [0], [0], [1], [0, 0, 1, 1], [], []>} : vector<8x128xbf16>, vector<128x128xbf16>, vector<8x128xf32> -> vector<8x128xf32>
      %c0_36 = arith.constant 0 : index
      %c0_37 = arith.constant 0 : index
      %59 = vector.load %arg12[%c0_36, %c0_37] : memref<1x128xf32, #tpu.memory_space<vmem>>, vector<1x128xf32>
      %60 = vector.broadcast %59 : vector<1x128xf32> to vector<8x128xf32>
      %61 = arith.addf %58, %60 : vector<8x128xf32>
      %62 = vector.extract_strided_slice %54 {offsets = [0, 128], sizes = [8, 128], strides = [1, 1]} : vector<8x256xf32> to vector<8x128xf32>
      %63 = arith.truncf %62 : vector<8x128xf32> to vector<8x128xbf16>
      %c0_38 = arith.constant 0 : index
      %c0_39 = arith.constant 0 : index
      %64 = vector.load %arg13[%c0_38, %c0_39] : memref<128x128xbf16, #tpu.memory_space<vmem>>, vector<128x128xbf16>
      %cst_40 = arith.constant dense<0.000000e+00> : vector<8x128xf32>
      %65 = tpu.matmul %63, %64, %cst_40 {dimension_numbers = #tpu.dot_dimension_numbers<[1], [0], [0], [1], [0, 0, 1, 1], [], []>} : vector<8x128xbf16>, vector<128x128xbf16>, vector<8x128xf32> -> vector<8x128xf32>
      %c0_41 = arith.constant 0 : index
      %c0_42 = arith.constant 0 : index
      %66 = vector.load %arg14[%c0_41, %c0_42] : memref<1x128xf32, #tpu.memory_space<vmem>>, vector<1x128xf32>
      %67 = vector.broadcast %66 : vector<1x128xf32> to vector<8x128xf32>
      %68 = arith.addf %65, %67 : vector<8x128xf32>
      %cst_43 = arith.constant 0.000000e+00 : f32
      %69 = vector.broadcast %cst_43 : f32 to vector<8x128xf32>
      %70 = arith.maximumf %61, %69 : vector<8x128xf32>
      %cst_44 = arith.constant 0.000000e+00 : f32
      %71 = vector.broadcast %cst_44 : f32 to vector<8x128xf32>
      %72 = arith.maximumf %68, %71 : vector<8x128xf32>
      %73 = tpu.concatenate %70, %72 in 1 : vector<8x128xf32>, vector<8x128xf32> -> vector<8x256xf32>
      %74 = arith.truncf %73 : vector<8x256xf32> to vector<8x256xbf16>
      %c0_45 = arith.constant 0 : index
      %c0_46 = arith.constant 0 : index
      %75 = vector.load %arg15[%c0_45, %c0_46] : memref<256x2xbf16, #tpu.memory_space<vmem>>, vector<256x2xbf16>
      %cst_47 = arith.constant dense<0.000000e+00> : vector<8x2xf32>
      %76 = tpu.matmul %74, %75, %cst_47 {dimension_numbers = #tpu.dot_dimension_numbers<[1], [0], [0], [1], [0, 0, 1, 1], [], []>} : vector<8x256xbf16>, vector<256x2xbf16>, vector<8x2xf32> -> vector<8x2xf32>
      %c0_48 = arith.constant 0 : index
      %c0_49 = arith.constant 0 : index
      %77 = vector.load %arg16[%c0_48, %c0_49] : memref<1x2xf32, #tpu.memory_space<vmem>>, vector<1x2xf32>
      %78 = vector.broadcast %77 : vector<1x2xf32> to vector<8x2xf32>
      %79 = arith.addf %76, %78 : vector<8x2xf32>
      %c0_50 = arith.constant 0 : index
      %c0_51 = arith.constant 0 : index
      %80 = vector.load %arg17[%c0_50, %c0_51] : memref<8x2xf32, #tpu.memory_space<vmem>>, vector<8x2xf32>
      tpu.vector_store %arg17[%c0_50, %c0_51], %79 {strides = array<i32>} : memref<8x2xf32, #tpu.memory_space<vmem>>, vector<8x2xf32>,
    } else {
    }
    return
  }
  func.func @transform_0(%arg0: i32, %arg1: i32) -> (i32, i32) {
    %c0_i32 = arith.constant 0 : i32
    return %arg0, %arg1 : i32, i32
  }
  func.func @transform_1(%arg0: i32, %arg1: i32) -> (i32, i32) {
    %c0_i32 = arith.constant 0 : i32
    %c0_i32_0 = arith.constant 0 : i32
    return %arg0, %c0_i32 : i32, i32
  }
  func.func @transform_2(%arg0: i32, %arg1: i32) -> (i32, i32) {
    %c0_i32 = arith.constant 0 : i32
    %c0_i32_0 = arith.constant 0 : i32
    return %arg1, %c0_i32 : i32, i32
  }
  func.func @transform_3(%arg0: i32, %arg1: i32) -> (i32, i32) {
    %c0_i32 = arith.constant 0 : i32
    %c0_i32_0 = arith.constant 0 : i32
    %c0_i32_1 = arith.constant 0 : i32
    return %c0_i32, %c0_i32_0 : i32, i32
  }
  func.func @transform_4(%arg0: i32, %arg1: i32) -> (i32, i32) {
    %c0_i32 = arith.constant 0 : i32
    %c0_i32_0 = arith.constant 0 : i32
    %c0_i32_1 = arith.constant 0 : i32
    return %c0_i32, %c0_i32_0 : i32, i32
  }
  func.func @transform_5(%arg0: i32, %arg1: i32) -> (i32, i32) {
    %c0_i32 = arith.constant 0 : i32
    %c0_i32_0 = arith.constant 0 : i32
    %c0_i32_1 = arith.constant 0 : i32
    return %c0_i32, %c0_i32_0 : i32, i32
  }
  func.func @transform_6(%arg0: i32, %arg1: i32) -> (i32, i32) {
    %c0_i32 = arith.constant 0 : i32
    %c0_i32_0 = arith.constant 0 : i32
    %c0_i32_1 = arith.constant 0 : i32
    return %c0_i32, %c0_i32_0 : i32, i32
  }
  func.func @transform_7(%arg0: i32, %arg1: i32) -> (i32, i32) {
    %c0_i32 = arith.constant 0 : i32
    %c0_i32_0 = arith.constant 0 : i32
    %c0_i32_1 = arith.constant 0 : i32
    return %c0_i32, %c0_i32_0 : i32, i32
  }
  func.func @transform_8(%arg0: i32, %arg1: i32) -> (i32, i32) {
    %c0_i32 = arith.constant 0 : i32
    %c0_i32_0 = arith.constant 0 : i32
    %c0_i32_1 = arith.constant 0 : i32
    return %c0_i32, %c0_i32_0 : i32, i32
  }
  func.func @transform_9(%arg0: i32, %arg1: i32) -> (i32, i32) {
    %c0_i32 = arith.constant 0 : i32
    %c0_i32_0 = arith.constant 0 : i32
    %c0_i32_1 = arith.constant 0 : i32
    return %c0_i32, %c0_i32_0 : i32, i32
  }
  func.func @transform_10(%arg0: i32, %arg1: i32) -> (i32, i32) {
    %c0_i32 = arith.constant 0 : i32
    %c0_i32_0 = arith.constant 0 : i32
    %c0_i32_1 = arith.constant 0 : i32
    return %c0_i32, %c0_i32_0 : i32, i32
  }
  func.func @transform_11(%arg0: i32, %arg1: i32) -> (i32, i32) {
    %c0_i32 = arith.constant 0 : i32
    %c0_i32_0 = arith.constant 0 : i32
    %c0_i32_1 = arith.constant 0 : i32
    return %c0_i32, %c0_i32_0 : i32, i32
  }
  func.func @transform_12(%arg0: i32, %arg1: i32) -> (i32, i32) {
    %c0_i32 = arith.constant 0 : i32
    %c0_i32_0 = arith.constant 0 : i32
    %c0_i32_1 = arith.constant 0 : i32
    return %c0_i32, %c0_i32_0 : i32, i32
  }
  func.func @transform_13(%arg0: i32, %arg1: i32) -> (i32, i32) {
    %c0_i32 = arith.constant 0 : i32
    %c0_i32_0 = arith.constant 0 : i32
    %c0_i32_1 = arith.constant 0 : i32
    return %c0_i32, %c0_i32_0 : i32, i32
  }
  func.func @transform_14(%arg0: i32, %arg1: i32) -> (i32, i32) {
    %c0_i32 = arith.constant 0 : i32
    %c0_i32_0 = arith.constant 0 : i32
    %c0_i32_1 = arith.constant 0 : i32
    return %c0_i32, %c0_i32_0 : i32, i32
  }
  func.func @transform_15(%arg0: i32, %arg1: i32) -> (i32, i32) {
    %c0_i32 = arith.constant 0 : i32
    %c0_i32_0 = arith.constant 0 : i32
    return %arg0, %c0_i32 : i32, i32
  }
}

</mosaic_0001>

<bundles_post_ra>
// kernel: tpu_custom_call.1
= control target key start
LH: loop header
LB: loop body
LE: loop exit
PB: predicated region body
PF: predicated region fallthrough
CT: control target
= control target key end

     0   :  { %s1685_s18 = smov 0   ;;  %s1687_s19 = smov 0   ;;  %s1933_s0 = inlined_call_operand.vmem [shape: f32[16,384], index: 0, kind: input, shape index: {}]   ;;  %s1934_s1 = inlined_call_operand.vmem [shape: f32[16,8], index: 1, kind: input, shape index: {}]   ;;  %s1935_s2 = inlined_call_operand.vmem [shape: bf16[384,64], index: 2, kind: input, shape index: {}]   ;;  %s1936_s3 = inlined_call_operand.vmem [shape: f32[1,64], index: 3, kind: input, shape index: {}]   ;;  %s1937_s4 = inlined_call_operand.vmem [shape: f32[1,64], index: 4, kind: input, shape index: {}]   ;;  %s1938_s5 = inlined_call_operand.vmem [shape: f32[1,64], index: 5, kind: input, shape index: {}]   ;;  %s1939_s6 = inlined_call_operand.vmem [shape: bf16[64,256], index: 6, kind: input, shape index: {}]   ;;  %s1940_s7 = inlined_call_operand.vmem [shape: bf16[8,256], index: 7, kind: input, shape index: {}]   ;;  %s1941_s8 = inlined_call_operand.vmem [shape: f32[1,256], index: 8, kind: input, shape index: {}]   ;;  %s1942_s9 = inlined_call_operand.vmem [shape: bf16[128,128], index: 9, kind: input, shape index: {}]   ;;  %s1943_s10 = inlined_call_operand.vmem [shape: f32[1,128], index: 10, kind: input, shape index: {}]   ;;  %s1944_s11 = inlined_call_operand.vmem [shape: bf16[128,128], index: 11, kind: input, shape index: {}]   ;;  %s1945_s12 = inlined_call_operand.vmem [shape: f32[1,128], index: 12, kind: input, shape index: {}]   ;;  %s1946_s13 = inlined_call_operand.vmem [shape: bf16[256,2], index: 13, kind: input, shape index: {}]   ;;  %s1947_s14 = inlined_call_operand.vmem [shape: f32[1,2], index: 14, kind: input, shape index: {}]   ;;  %s1948_s15 = inlined_call_operand.vmem [shape: f32[16,2], index: 15, kind: output, shape index: {}]  }
   0x1   :  { %1952 = sst [smem:[#allocation8_spill]] %s1941_s8  ;;  %s1689_s20 = smov 0  }
   0x2   :  { %1953 = sst [smem:[#allocation9_spill]] %s1943_s10  ;;  %s1691_s21 = smov 0  }
   0x3   :  { %1954 = sst [smem:[#allocation10_spill]] %s1945_s12  ;;  %s1693_s22 = smov 0  }
   0x4   :  { %1955 = sst [smem:[#allocation11_spill]] %s1947_s14 }
   0x5 LB: > { %1956 = sst [smem:[#allocation3_spill]] %s1593_s20  ;;  %s34_s23 = sadd.s32 1, %s1593_s20  ;;  %s1601_s22 = sphi %s1693_s22, %s25_s22   ;;  %s1597_s21 = sphi %s1691_s21, %s1969_s21   ;;  %s1593_s20 = sphi %s1689_s20, %s1968_s20   ;;  %s1589_s19 = sphi %s1687_s19, %s1967_s19   ;;  %s1585_s18 = sphi %s1685_s18, %s1966_s18  }
   0x6   : > { %1957 = sst [smem:[#allocation4_spill]] %s1597_s21  ;;  %s37_s24 = sadd.s32 1, %s1597_s21 }
   0x7   : > { %1958 = sst [smem:[#allocation5_spill]] %s1601_s22  ;;  %p35_p0 = scmp.ge.s32.totalorder %s34_s23, 3 }
   0x8   : > { %p1254_p1 = scmp.ge.s32.totalorder %s1601_s22, 1  ;;  %p474_p2 = scmp.lt.s32.totalorder %s1601_s22, 7 }
   0x9   : > { %s1971_s23 = smov (%p35_p0, %s34_s23), 0  ;;  %s1973_s24 = smov (!%p35_p0, %s37_s24), %s1597_s21 }
   0xa   : > { %1959 = sst [smem:[#allocation6_spill]] %s1971_s23  ;;  %p475_p3 = pnand %p1254_p1, %p474_p2 }
   0xb   : > { %p39_p4 = scmp.ge.s32.totalorder %s1973_s24, 2  ;;  %p533_p5 = scmp.lt.s32.totalorder (!%p475_p3), %s1589_s19, 1 }
   0xc   : > { %478 = sbr.rel (%p475_p3) target bundleno = 889 (0x379), region = 80  ;;  %p535_p6 = scmp.lt.s32.totalorder (!%p475_p3), %s1585_s18, 2 }
   0xd   : > { %s1975_s24 = smov (%p39_p4, %s1973_s24), 0  ;;  %s1257_s25 = sshll.u32 (!%p475_p3), %s1585_s18, 4 }
   0xe   : > { %1960 = sst [smem:[#allocation7_spill]] %s1975_s24  ;;  %p546_p7 = scmp.lt.s32.totalorder (!%p475_p3), %s1257_s25, 47 }
   0xf   : > { %p1260_p8 = scmp.ne.s32.totalorder (!%p475_p3), %s1585_s18, 0 }
  0x11   : > { %s1977_s19 = smov (!%p533_p5, %s1589_s19), 1  ;;  %s1979_s25 = smov (!%p546_p7, %s1257_s25), 47 }
  0x12   : > { %s536_s26 = scalar_select %p535_p6, %s1585_s18, 2 }
  0x13   : > { %s1508_s27 = smul.u32 3, %s1977_s19  ;;  %s1256_s28 = sshll.u32 %s1977_s19, 3 }
  0x14   : > { %s1723_s16 = scalar_lea.vmem %s1934_s1, %s1256_s28  ;;  %s1728_s21 = scalar_lea.vmem %s1948_s15, %s1256_s28 }
  0x15   : > { %s538_s17 = sadd.s32 %s1508_s27, %s536_s26  ;;  %s1258_s10 = sshll.u32 %s1979_s25, 2 }
  0x16   : > { %s1255_s20 = sshll.u32 %s538_s17, 3  ;;  %s549_s29 = scalar_lea.vmem %s1935_s2, %s1258_s10 }
  0x17   : > { %s540_s12 = scalar_lea.vmem %s1933_s0, %s1255_s20  ;;  %559 = sbr.rel (%p1260_p8) target bundleno = 30 (0x1e), region = 84 }
  0x1c   : > { %vm560_vm0 = vcmask 523264   ;;  %v1603_v0 = vmov 0.0  }
  0x1d   : > { %561 = vst.msk [vmem:[#allocation2] sm:$0xff] %vm560_vm0, %v1603_v0 }
  0x1e PF: > { %v1467_v1 = vld [vmem:[%s549_s29 + $0x38] sm:$0xff]  ;;  %v1466_v2 = vld [vmem:[%s549_s29 + $0x30] sm:$0xff]  ;;  %v1465_v3 = vld [vmem:[%s549_s29 + $0x28] sm:$0xff]  ;;  %vm643_vm1 = vcmask 523264   ;;  %p1293_p9 = scmp.ne.s32.totalorder %s1585_s18, 2 }
  0x1f   : > { %629 = vmatpush.bf16.msra.mxu0 %v1467_v1  ;;  %v1464_v4 = vld [vmem:[%s549_s29 + $0x20] sm:$0xff]  ;;  %v1463_v5 = vld [vmem:[%s549_s29 + $0x18] sm:$0xff]  ;;  %v1462_v6 = vld [vmem:[%s549_s29 + $0x10] sm:$0xff]  ;;  %s1961_s25 = sld [smem:[#allocation8_spill]] (!%p1293_p9) }
  0x20   : > { %v1461_v7 = vld [vmem:[%s549_s29 + $0x8] sm:$0xff]  ;;  %v1460_v8 = vld [vmem:[%s549_s29] sm:$0xff]  ;;  %s1963_s20 = sld [smem:[#allocation10_spill]] (!%p1293_p9) }
  0x21   : > { %v563_v9 = vld [vmem:[%s540_s12] sm:$0xff]  ;;  %s1962_s12 = sld [smem:[#allocation9_spill]] (!%p1293_p9) }
  0x22   : > { %v564_v10 = vpack.c.bf16 %v563_v9, %v563_v9  ;;  %s1964_s24 = sld [smem:[#allocation11_spill]] (!%p1293_p9) }
  0x23   : > { %630 = vmatpush.bf16.msra.mxu0 %v1466_v2 }
  0x24   : > { %v562_v11 = vld [vmem:[#allocation2] sm:$0xff] }
  0x27   : > { %631 = vmatpush.bf16.msra.mxu0 %v1465_v3 }
  0x2b   : > { %632 = vmatpush.bf16.msra.mxu0 %v1464_v4 }
  0x2f   : > { %633 = vmatpush.bf16.msra.mxu0 %v1463_v5 }
  0x33   : > { %634 = vmatpush.bf16.msra.mxu0 %v1462_v6 }
  0x37   : > { %635 = vmatpush.bf16.msra.mxu0 %v1461_v7 }
  0x3b   : > { %636 = vmatpush.bf16.msra.mxu0 %v1460_v8 }
  0x3e   : > { %637 = vmatmul.bf16.vlgmr.msra.gmra.mxu0 %v564_v10 }
  0xbb   : > { %v638_v12 = vpop.f32.mrf.mxu0 }
  0xbc   : > { %v642_v13 = vadd.f32 %v638_v12, %v562_v11 }
  0xbe   : > { %644 = vst.msk [vmem:[#allocation2] sm:$0xff] %vm643_vm1, %v642_v13 }
  0xbf   : > { %648 = sbr.rel (%p1293_p9) target bundleno = 889 (0x379), region = 88 }
  0xc3   : > { %v640_v14 = vpop.f32.mrf.mxu0 }
  0xc4   : > { %v1551_v16 = vld [vmem:[%s1936_s3] ss:$0 sm:$0xff]  ;;  %v1604_v19 = vmov 64.0   ;;  %v1322_v31 = vld [vmem:[%s1939_s6 + $0x30] sm:$0xf]  ;;  %vm716_vm3 = vcmask 1043456  }
  0xc5   : > { %v649_v15 = vld [vmem:[#allocation2] sm:$0xff]  ;;  %1557 = vrcp.f32 %v1604_v19  ;;  %v1475_v32 = vld [vmem:[%s1939_s6 + $0x34] sm:$0xf0]  ;;  %v1474_v33 = vld [vmem:[%s1939_s6 + $0x34] sm:$0xf]  ;;  %vm712_vm4 = vcmask 64512  }
  0xc6   : > { %v654_v17 = vadd.f32 %v1551_v16, %v649_v15  ;;  %v1323_v34 = vor.u32 %v1475_v32, %v1322_v31  ;;  %v1324_v35 = vld [vmem:[%s1939_s6 + $0x38] sm:$0xf0]  ;;  %v1314_v36 = vld [vmem:[%s1939_s6 + $0x20] sm:$0xf]  ;;  %v1473_v37 = vld [vmem:[%s1939_s6 + $0x24] sm:$0xf0] }
  0xc7   : > { %v1327_v38 = vor.u32 %v1474_v33, %v1324_v35  ;;  %v1472_v39 = vld [vmem:[%s1939_s6 + $0x24] sm:$0xf]  ;;  %v1316_v40 = vld [vmem:[%s1939_s6 + $0x28] sm:$0xf0]  ;;  %v1315_v41 = vor.u32 %v1473_v37, %v1314_v36  ;;  %v1306_v43 = vld [vmem:[%s1939_s6 + $0x10] sm:$0xf] }
  0xc8   : > { %v655_v18 = vsel %vm643_vm1, %v654_v17, 0.0  ;;  %796 = vmatpush.bf16.msra.mxu2 %v1323_v34  ;;  %v1319_v42 = vor.u32 %v1472_v39, %v1316_v40  ;;  %v1471_v44 = vld [vmem:[%s1939_s6 + $0x14] sm:$0xf0]  ;;  %v706_v45 = vld [vmem:[%s1940_s7] sm:$0xff]  ;;  %v1470_v46 = vld [vmem:[%s1939_s6 + $0x14] sm:$0xf] }
  0xc9   : > { %656 = vadd.xlane.f32.xlu0 %v655_v18  ;;  %809 = vmatpush.bf16.msra.mxu3 %v1327_v38  ;;  %v1308_v47 = vld [vmem:[%s1939_s6 + $0x18] sm:$0xf0]  ;;  %v708_v48 = vunpack.c.l.b16 %v706_v45  ;;  %v709_v49 = vunpack.c.h.b16 %v706_v45  ;;  %v704_v50 = vld [vmem:[%s1723_s16] sm:$0xff]  ;;  %v1307_v51 = vor.u32 %v1471_v44, %v1306_v43  ;;  %v1469_v56 = vld [vmem:[%s1939_s6 + $0x4] sm:$0xf0]  ;;  %vm1154_vm8 = vcmask 15360  }
  0xca   : > { %v1311_v54 = vor.u32 %v1470_v46, %v1308_v47  ;;  %v1298_v55 = vld [vmem:[%s1939_s6] sm:$0xf]  ;;  %v1468_v59 = vld [vmem:[%s1939_s6 + $0x4] sm:$0xf]  ;;  %v1300_v60 = vld [vmem:[%s1939_s6 + $0x8] sm:$0xf0]  ;;  %v705_v61 = vpack.c.bf16 %v704_v50, %v704_v50 }
  0xcb   : > { %v1558_v20 = vpop.eup %1557  ;;  %v710_v52 = vpack.c.b16 %v708_v48, %v708_v48  ;;  %v711_v53 = vpack.c.b16 %v709_v49, %v709_v49  ;;  %v1299_v62 = vor.u32 %v1469_v56, %v1298_v55  ;;  %v1303_v0 = vor.u32 %v1468_v59, %v1300_v60  ;;  %v1483_v3 = vld [vmem:[%s1942_s9 + $0x38] sm:$0xff]  ;;  %v1482_v5 = vld [vmem:[%s1942_s9 + $0x30] sm:$0xff]  ;;  %v1481_v9 = vld [vmem:[%s1942_s9 + $0x28] sm:$0xff] }
  0xcc   : > { %v659_v21 = vmul.f32 64.0, %v1558_v20  ;;  %vm663_vm2 = vweird.f32 %v1558_v20  ;;  %797 = vmatpush.bf16.msra.mxu2 %v1315_v41  ;;  %v1491_v4 = vld [vmem:[%s1944_s11 + $0x38] sm:$0xff]  ;;  %v1490_v6 = vld [vmem:[%s1944_s11 + $0x30] sm:$0xff]  ;;  %v1489_v10 = vld [vmem:[%s1944_s11 + $0x28] sm:$0xff] }
  0xcd   : > { %810 = vmatpush.bf16.msra.mxu3 %v1319_v42  ;;  %v718_v57 = vsel %vm716_vm3, %v710_v52, 0  ;;  %v721_v58 = vsel %vm716_vm3, %v711_v53, 0  ;;  %v1480_v13 = vld [vmem:[%s1942_s9 + $0x20] sm:$0xff]  ;;  %v1477_v33 = vld [vmem:[%s1942_s9 + $0x8] sm:$0xff]  ;;  %v1499_v37 = vld [vmem:[%s1946_s13 + $0x38] sm:$0xff] }
  0xce   : > { %v660_v22 = vsub.f32 1.0, %v659_v21  ;;  %730 = vmatpush.bf16.msra.mxu0 %v718_v57  ;;  %743 = vmatpush.bf16.msra.mxu1 %v721_v58  ;;  %v1488_v14 = vld [vmem:[%s1944_s11 + $0x20] sm:$0xff]  ;;  %v1485_v34 = vld [vmem:[%s1944_s11 + $0x8] sm:$0xff]  ;;  %v1507_v38 = vld [vmem:[%s1946_s13 + $0x78] sm:$0xff] }
  0xcf   : > { %v1476_v35 = vld [vmem:[%s1942_s9] sm:$0xff]  ;;  %v1498_v39 = vld [vmem:[%s1946_s13 + $0x30] sm:$0xff]  ;;  %v1497_v41 = vld [vmem:[%s1946_s13 + $0x28] sm:$0xff] }
  0xd0   : > { %v661_v23 = vmul.f32 %v1558_v20, %v660_v22  ;;  %798 = vmatpush.bf16.msra.mxu2 %v1307_v51  ;;  %v1484_v36 = vld [vmem:[%s1944_s11] sm:$0xff]  ;;  %v1506_v40 = vld [vmem:[%s1946_s13 + $0x70] sm:$0xff]  ;;  %v1505_v42 = vld [vmem:[%s1946_s13 + $0x68] sm:$0xff] }
  0xd1   : > { %811 = vmatpush.bf16.msra.mxu3 %v1311_v54  ;;  %1294 = vmatmul.msk.bf16.vlgmr.msra.gmra.mxu0 %vm712_vm4, %v705_v61  ;;  %v1496_v43 = vld [vmem:[%s1946_s13 + $0x20] sm:$0xff]  ;;  %v1495_v45 = vld [vmem:[%s1946_s13 + $0x18] sm:$0xff]  ;;  %v1494_v47 = vld [vmem:[%s1946_s13 + $0x10] sm:$0xff] }
  0xd2   : > { %v662_v24 = vadd.f32 %v1558_v20, %v661_v23  ;;  %1295 = vmatmul.msk.bf16.vlgmr.msra.gmra.mxu1 %vm712_vm4, %v705_v61  ;;  %897 = vmatpush.bf16.msrb.mxu0 %v1483_v3  ;;  %v1504_v44 = vld [vmem:[%s1946_s13 + $0x60] sm:$0xff]  ;;  %v1503_v46 = vld [vmem:[%s1946_s13 + $0x58] sm:$0xff]  ;;  %v1502_v48 = vld [vmem:[%s1946_s13 + $0x50] sm:$0xff] }
  0xd3   : > { %979 = vmatpush.bf16.msrb.mxu1 %v1491_v4  ;;  %v818_v49 = vld [vmem:[%s1961_s25] sm:$0x3] }
  0xd4   : > { %v664_v25 = vsel %vm663_vm2, %v1558_v20, %v662_v24  ;;  %799 = vmatpush.bf16.msra.mxu2 %v1299_v62  ;;  %v1553_v20 = vld [vmem:[%s1938_s5] ss:$0 sm:$0xff]  ;;  %v820_v50 = vperm.slane %v818_v49, 0  ;;  %v821_v51 = vperm.slane %v818_v49, 1 }
  0xd5   : > { %812 = vmatpush.bf16.msra.mxu3 %v1303_v0  ;;  %v1493_v0 = vld [vmem:[%s1946_s13 + $0x8] sm:$0xff]  ;;  %v1500_v3 = vld [vmem:[%s1946_s13 + $0x40] sm:$0xff] }
  0xd6   : > { %898 = vmatpush.bf16.msrb.mxu0 %v1482_v5  ;;  %v1554_v4 = vld [vmem:[%s1962_s12] ss:$0 sm:$0xff] }
  0xd7   : > { %980 = vmatpush.bf16.msrb.mxu1 %v1490_v6  ;;  %v1555_v5 = vld [vmem:[%s1963_s20] ss:$0 sm:$0xff] }
  0xd8   : > { %1128 = vmatpush.bf16.msrb.mxu2 %v1499_v37 }
  0xd9   : > { %1141 = vmatpush.bf16.msrb.mxu3 %v1507_v38 }
  0xda   : > { %899 = vmatpush.bf16.msrb.mxu0 %v1481_v9 }
  0xdb   : > { %981 = vmatpush.bf16.msrb.mxu1 %v1489_v10 }
  0xdc   : > { %1129 = vmatpush.bf16.msrb.mxu2 %v1498_v39 }
  0xdd   : > { %1142 = vmatpush.bf16.msrb.mxu3 %v1506_v40 }
  0xde   : > { %900 = vmatpush.bf16.msrb.mxu0 %v1480_v13 }
  0xdf   : > { %982 = vmatpush.bf16.msrb.mxu1 %v1488_v14 }
  0xe0   : > { %1130 = vmatpush.bf16.msrb.mxu2 %v1497_v41 }
  0xe1   : > { %1143 = vmatpush.bf16.msrb.mxu3 %v1505_v42 }
  0xe4   : > { %1131 = vmatpush.bf16.msrb.mxu2 %v1496_v43 }
  0xe5   : > { %1144 = vmatpush.bf16.msrb.mxu3 %v1504_v44 }
  0xe8   : > { %1132 = vmatpush.bf16.msrb.mxu2 %v1495_v45 }
  0xe9   : > { %1145 = vmatpush.bf16.msrb.mxu3 %v1503_v46 }
  0xec   : > { %1133 = vmatpush.bf16.msrb.mxu2 %v1494_v47 }
  0xed   : > { %1146 = vmatpush.bf16.msrb.mxu3 %v1502_v48 }
  0xf0   : > { %1134 = vmatpush.bf16.msrb.mxu2 %v1493_v0 }
 0x13c   : > { %v657_v26 = vpop.xlane.xlu0 %656 }
 0x13d   : > { %v665_v27 = vmul.f32 %v664_v25, %v657_v26  ;;  %v1487_v26 = vld [vmem:[%s1944_s11 + $0x18] sm:$0xff] }
 0x13e   : > { %983 = vmatpush.bf16.msrb.mxu1 %v1487_v26 }
 0x13f   : > { %v1743_v28 = vsub.f32 %v654_v17, %v665_v27  ;;  %v1552_v17 = vld [vmem:[%s1937_s4] ss:$0 sm:$0xff]  ;;  %v1478_v27 = vld [vmem:[%s1942_s9 + $0x10] sm:$0xff] }
 0x141   : > { %v667_v29 = vmul.f32 %v1743_v28, %v1743_v28 }
 0x143   : > { %v668_v30 = vsel %vm643_vm1, %v667_v29, 0.0 }
 0x144   : > { %669 = vadd.xlane.f32.xlu0 %v668_v30 }
 0x14e   : > { %v732_v29 = vpop.f32.mrf.mxu0 }
 0x14f   : > { %v745_v30 = vpop.f32.mrf.mxu1 }
 0x156   : > { %v734_v31 = vpop.f32.mrf.mxu0 }
 0x157   : > { %v747_v32 = vpop.f32.mrf.mxu1 }
 0x1b7   : > { %v670_v63 = vpop.xlane.xlu0 %669 }
 0x1b8   : > { %v671_v1 = vmul.f32 %v670_v63, %v664_v25  ;;  %v1479_v25 = vld [vmem:[%s1942_s9 + $0x18] sm:$0xff] }
 0x1b9   : > { %901 = vmatpush.bf16.msrb.mxu0 %v1479_v25 }
 0x1ba   : > { %v672_v2 = vadd.f32 1e-05, %v671_v1  ;;  %v1501_v1 = vld [vmem:[%s1946_s13 + $0x48] sm:$0xff] }
 0x1bb   : > { %1147 = vmatpush.bf16.msrb.mxu3 %v1501_v1 }
 0x1bc   : > { %1559 = vrsqrt.f32 %v672_v2  ;;  %vm679_vm6 = vweird.f32 %v672_v2 }
 0x1bd   : > { %902 = vmatpush.bf16.msrb.mxu0 %v1478_v27 }
 0x1bf   : > { %1148 = vmatpush.bf16.msrb.mxu3 %v1500_v3 }
 0x1c1   : > { %903 = vmatpush.bf16.msrb.mxu0 %v1477_v33 }
 0x1c2   : > { %v1560_v7 = vpop.eup %1559 }
 0x1c3   : > { %v674_v8 = vmul.f32 %v1560_v7, %v672_v2  ;;  %vm680_vm5 = vweird.f32 %v1560_v7  ;;  %v1492_v2 = vld [vmem:[%s1946_s13] sm:$0xff] }
 0x1c4   : > { %vm681_vm7 = vmor %vm679_vm6, %vm680_vm5  ;;  %1135 = vmatpush.bf16.msrb.mxu2 %v1492_v2 }
 0x1c5   : > { %v675_v11 = vmul.f32 %v1560_v7, %v674_v8  ;;  %904 = vmatpush.bf16.msrb.mxu0 %v1476_v35 }
 0x1c7   : > { %v676_v12 = vmul.f32 0.5, %v675_v11 }
 0x1c9   : > { %v677_v15 = vsub.f32 1.5, %v676_v12 }
 0x1cb   : > { %v678_v16 = vmul.f32 %v1560_v7, %v677_v15 }
 0x1cd   : > { %v682_v18 = vsel %vm681_vm7, %v1560_v7, %v678_v16  ;;  %v1556_v16 = vld [vmem:[%s1964_s24] ss:$0 sm:$0xff] }
 0x1ce   : > { %v683_v19 = vmul.f32 %v682_v18, %v1743_v28  ;;  %v1486_v28 = vld [vmem:[%s1944_s11 + $0x10] sm:$0xff] }
 0x1cf   : > { %984 = vmatpush.bf16.msrb.mxu1 %v1486_v28 }
 0x1d0   : > { %v688_v21 = vmul.f32 %v1552_v17, %v683_v19 }
 0x1d2   : > { %v693_v22 = vadd.f32 %v1553_v20, %v688_v21 }
 0x1d3   : > { %985 = vmatpush.bf16.msrb.mxu1 %v1485_v34 }
 0x1d4   : > { %1561 = vtanh.f32 %v693_v22 }
 0x1d7   : > { %986 = vmatpush.bf16.msrb.mxu1 %v1484_v36 }
 0x1da   : > { %v1562_v23 = vpop.eup %1561 }
 0x1db   : > { %v695_v24 = vpack.c.bf16 %v1562_v23, %v1562_v23 }
 0x1dd   : > { %1328 = vmatmul.msk.bf16.vlgmr.msra.gmra.mxu2 %vm643_vm1, %v695_v24  ;;  %1329 = vmatmul.msk.bf16.vlgmr.msra.gmra.mxu3 %vm643_vm1, %v695_v24 }
 0x260   : > { %v801_v52 = vpop.f32.mrf.mxu2  ;;  %v814_v53 = vpop.f32.mrf.mxu3 }
 0x261   : > { %v802_v54 = vadd.f32 %v801_v52, %v732_v29  ;;  %v815_v55 = vadd.f32 %v814_v53, %v745_v30 }
 0x263   : > { %v824_v56 = vadd.f32 %v820_v50, %v802_v54  ;;  %v825_v57 = vadd.f32 %v821_v51, %v815_v55 }
 0x265   : > { %v826_v58 = vmax.f32 %v824_v56, 0.0  ;;  %v827_v59 = vmax.f32 %v825_v57, 0.0 }
 0x267   : > { %v828_v60 = vpack.c.bf16 %v826_v58, %v826_v58  ;;  %v910_v61 = vpack.c.bf16 %v827_v59, %v827_v59 }
 0x268   : > { %v803_v62 = vpop.f32.mrf.mxu2  ;;  %v816_v63 = vpop.f32.mrf.mxu3 }
 0x269   : > { %905 = vmatmul.bf16.vlgmr.msrb.gmra.mxu0 %v828_v60  ;;  %987 = vmatmul.bf16.vlgmr.msrb.gmra.mxu1 %v910_v61 }
 0x2e6   : > { %v906_v6 = vpop.f32.mrf.mxu0  ;;  %v988_v7 = vpop.f32.mrf.mxu1 }
 0x2e7   : > { %v907_v8 = vadd.f32 %v1554_v4, %v906_v6  ;;  %v989_v9 = vadd.f32 %v1555_v5, %v988_v7 }
 0x2e9   : > { %v992_v10 = vmax.f32 %v907_v8, 0.0  ;;  %v993_v11 = vmax.f32 %v989_v9, 0.0 }
 0x2eb   : > { %v994_v12 = vpack.c.bf16 %v992_v10, %v992_v10  ;;  %v995_v13 = vpack.c.bf16 %v993_v11, %v993_v11 }
 0x2ed   : > { %1136 = vmatmul.bf16.vlgmr.msrb.gmra.mxu2 %v994_v12  ;;  %1149 = vmatmul.bf16.vlgmr.msrb.gmra.mxu3 %v995_v13 }
 0x2ee   : > { %v908_v14 = vpop.f32.mrf.mxu0  ;;  %v990_v15 = vpop.f32.mrf.mxu1 }
 0x370   : > { %v1137_v17 = vpop.f32.mrf.mxu2  ;;  %v1150_v18 = vpop.f32.mrf.mxu3 }
 0x371   : > { %v1138_v19 = vadd.f32 %v1556_v16, %v1137_v17 }
 0x373   : > { %v1151_v20 = vadd.f32 %v1150_v18, %v1138_v19 }
 0x375   : > { %1155 = vst.msk [vmem:[%s1728_s21] sm:$0xff] %vm1154_vm8, %v1151_v20 }
 0x378   : > { %v1139_v21 = vpop.f32.mrf.mxu2  ;;  %v1152_v22 = vpop.f32.mrf.mxu3 }
 0x379 PF: > { %s1965_s25 = sld [smem:[#allocation5_spill]] }
 0x37a   : > { %s1966_s18 = sld [smem:[#allocation3_spill]] }
 0x37b   : > { %s1967_s19 = sld [smem:[#allocation4_spill]] }
 0x37c   : > { %s1968_s20 = sld [smem:[#allocation6_spill]] }
 0x37d   : > { %s1969_s21 = sld [smem:[#allocation7_spill]] }
 0x37f   : > { %s25_s22 = sadd.s32 1, %s1965_s25  }
 0x380   : > { %p22_p10 = scmp.ge.s32.totalorder %s25_s22, 8  }
 0x382   :  { %24 = sbr.rel (!%p22_p10) target bundleno = 5 (0x5), region = 124 }

</bundles_post_ra>
